<compile_context>
chip_gen: v7x
topology: tpu7x:2x2x1
jax: 0.10.0
libtpu: 0.0.40
codegen_flags: <defaults>
</compile_context>

<pallas_src>
import functools

import numpy as np

import jax
import jax.numpy as jnp
from jax.experimental import pallas as pl
from jax.experimental.pallas import tpu as pltpu


def _ceil_div(a, b):
    return -(-a // b)


def _round_up(a, b):
    return _ceil_div(a, b) * b


def _constrained_mc_kernel(y_ref, out_ref, *, w_obj, w_con, con_biases,
                           infeasible_cost, eta):
    """y_ref: (o, TILE_R, C) channel planes; out_ref: (TILE_R, C)."""
    o = y_ref.shape[0]

    # Only touch channels referenced by a nonzero weight (weights are Python
    # constants, so this prunes loads at trace time -> fewer VMEM reads).
    used = [j for j in range(o)
            if w_obj[j] != 0.0 or any(w[j] != 0.0 for w in w_con)]
    planes = {j: y_ref[j].astype(jnp.float32) for j in used}

    # objective(samples): unrolled FMAs over the o channel planes (pure VPU).
    obj = jnp.zeros(out_ref.shape, jnp.float32)
    for j in range(o):
        if w_obj[j] != 0.0:
            obj = obj + jnp.float32(w_obj[j]) * planes[j]

    # clamp at -M then shift by M
    m = jnp.float32(infeasible_cost)
    obj = jnp.maximum(obj, -m) + m

    # multiply by soft feasibility indicator of each constraint
    inv_eta = jnp.float32(1.0 / eta)
    for w_i, b_i in zip(w_con, con_biases):
        c = jnp.full(out_ref.shape, jnp.float32(b_i), jnp.float32)
        for j in range(o):
            if w_i[j] != 0.0:
                c = c + jnp.float32(w_i[j]) * planes[j]
        # sigmoid(-c/eta): exp on the EUP slot, numerically stable for both
        # signs; multiply folds into the running feasibility-weighted value.
        obj = obj * jax.nn.sigmoid(-c * inv_eta)

    # shift back
    out_ref[...] = (obj - m).astype(out_ref.dtype)


def constrained_mc_objective(samples, w_obj, w_con, con_biases,
                             infeasible_cost=0.0, eta=1e-3,
                             lane_width=1024, tile_rows=256,
                             vmem_limit_bytes=32 * 1024 * 1024):
    """samples: (sample_shape, batch, q, o) -> (sample_shape, batch, q)."""
    sample_shape, batch, q, o = samples.shape
    L = sample_shape * batch * q
    itemsize = jnp.dtype(samples.dtype).itemsize

    # Weights become compile-time constants baked into the kernel.
    w_obj = tuple(float(x) for x in np.asarray(w_obj, np.float64).reshape(-1))
    w_con_arr = np.asarray(w_con, np.float64).reshape(-1, o)
    w_con = tuple(tuple(float(x) for x in row) for row in w_con_arr)
    con_biases = tuple(float(b) for b in con_biases)
    assert len(w_obj) == o
    assert len(con_biases) == len(w_con)

    # Lane-dense padded layout: L -> (R_total, C), C a multiple of 128,
    # R_total a multiple of the row tile.  Ragged L handled by zero padding
    # (padded results are sliced off after the kernel).
    C = _round_up(min(int(lane_width), _round_up(L, 128)), 128)
    rows = _ceil_div(L, C)

    # Cap the row tile so (double-buffered input block) + (double-buffered
    # output block) stays within ~75% of the scoped-VMEM limit.
    budget = int(vmem_limit_bytes * 0.75)
    max_tile_r = max(8, (budget // (2 * (o + 1) * C * itemsize)) // 8 * 8)
    tile_r = _round_up(min(int(tile_rows), max_tile_r, _round_up(rows, 8)), 8)
    num_blocks = _ceil_div(rows, tile_r)
    r_total = num_blocks * tile_r
    l_pad = r_total * C

    y = samples.reshape(L, o)
    if l_pad != L:
        y = jnp.pad(y, ((0, l_pad - L), (0, 0)))
    planes = y.T.reshape(o, r_total, C)      # (o, R_total, C), lane-dense

    kernel = functools.partial(
        _constrained_mc_kernel,
        w_obj=w_obj, w_con=w_con, con_biases=con_biases,
        infeasible_cost=float(infeasible_cost), eta=float(eta))

    out = pl.pallas_call(
        kernel,
        out_shape=jax.ShapeDtypeStruct((r_total, C), samples.dtype),
        grid_spec=pltpu.PrefetchScalarGridSpec(
            num_scalar_prefetch=0,
            grid=(num_blocks,),
            in_specs=[pl.BlockSpec((o, tile_r, C), lambda i: (0, i, 0))],
            out_specs=pl.BlockSpec((tile_r, C), lambda i: (i, 0)),
        ),
        compiler_params=pltpu.CompilerParams(
            dimension_semantics=("parallel",),
            vmem_limit_bytes=int(vmem_limit_bytes),
        ),
    )(planes)

    return out.reshape(-1)[:L].reshape(sample_shape, batch, q)


def _reference(samples, w_obj, w_con, con_biases, infeasible_cost, eta):
    y = samples.astype(jnp.float32)
    o = y.shape[-1]
    w_obj = jnp.asarray(w_obj, jnp.float32).reshape(-1)
    w_con = jnp.asarray(w_con, jnp.float32).reshape(-1, o)
    obj = jnp.sum(y * w_obj.reshape(1, 1, 1, -1), axis=-1)
    obj = jnp.maximum(obj, -infeasible_cost) + infeasible_cost
    for i in range(w_con.shape[0]):
        c = jnp.sum(y * w_con[i].reshape(1, 1, 1, -1), axis=-1) + con_biases[i]
        obj = obj * jax.nn.sigmoid(-c / eta)
    return (obj - infeasible_cost).astype(samples.dtype)


if __name__ == "__main__":
    key = jax.random.PRNGKey(0)
    k1, k2, k3 = jax.random.split(key, 3)
    checks = []

    # Test 1: botorch docstring example  (objective = Y[...,0],
    # constraint = bound - Y[...,1], bound = 0).
    samples1 = jax.random.normal(k1, (4, 4, 8, 4), dtype=jnp.float32)
    w_obj1 = [1.0, 0.0, 0.0, 0.0]
    w_con1 = [[0.0, -1.0, 0.0, 0.0]]
    b1 = [0.0]
    out1 = constrained_mc_objective(samples1, w_obj1, w_con1, b1,
                                    infeasible_cost=0.5, eta=1e-3)
    ref1 = _reference(samples1, w_obj1, w_con1, b1, 0.5, 1e-3)
    checks.append((out1, ref1, (4, 4, 8)))

    # Test 2: ragged L (not a multiple of 128) -> exercises zero padding.
    samples2 = jax.random.normal(k2, (3, 5, 7, 4), dtype=jnp.float32)
    out2 = constrained_mc_objective(samples2, w_obj1, w_con1, b1,
                                    infeasible_cost=0.25, eta=1e-3)
    ref2 = _reference(samples2, w_obj1, w_con1, b1, 0.25, 1e-3)
    checks.append((out2, ref2, (3, 5, 7)))

    # Test 3: multi-block grid, two constraints, general weights.
    samples3 = jax.random.normal(k3, (4, 8, 40, 4), dtype=jnp.float32)
    w_obj3 = [1.0, 0.0, 0.5, -0.25]
    w_con3 = [[0.0, -1.0, 0.0, 0.0], [0.3, 0.0, 0.0, 1.0]]
    b3 = [0.1, -0.2]
    out3 = constrained_mc_objective(samples3, w_obj3, w_con3, b3,
                                    infeasible_cost=1.0, eta=0.25,
                                    lane_width=128, tile_rows=8)
    ref3 = _reference(samples3, w_obj3, w_con3, b3, 1.0, 0.25)
    checks.append((out3, ref3, (4, 8, 40)))

    for out, ref, shape in checks:
        out = jax.block_until_ready(out)
        assert out.shape == shape, (out.shape, shape)
        err = jnp.max(jnp.abs(out - ref))
        assert jnp.allclose(out, ref, atol=1e-4, rtol=1e-4), \
            f"mismatch vs reference: max abs err {err}"

    print("KERNEL_OK")
</pallas_src>

<mosaic_0001>
module attributes {stable_mosaic.version = 11 : i64} {
  func.func @_constrained_mc_kernel(%arg0: i32, %arg1: memref<4x8x128xf32, #tpu.memory_space<vmem>>, %arg2: memref<8x128xf32, #tpu.memory_space<vmem>>) attributes {dimension_semantics = [#tpu.dimension_semantics<parallel>], iteration_bounds = array<i64: 1>, scalar_prefetch = 0 : i64, scratch_operands = 0 : i64, tpu.core_type = #tpu.core_type<tc>, window_params = [{transform_indices = @transform_0, window_bounds = array<i64: 4, 8, 128>}, {transform_indices = @transform_1, window_bounds = array<i64: 8, 128>}]} {
    %c0 = arith.constant 0 : index
    %c0_0 = arith.constant 0 : index
    %c0_1 = arith.constant 0 : index
    %0 = vector.load %arg1[%c0, %c0_0, %c0_1] : memref<4x8x128xf32, #tpu.memory_space<vmem>>, vector<1x8x128xf32>
    %1 = vector.shape_cast %0 : vector<1x8x128xf32> to vector<8x128xf32>
    %c1 = arith.constant 1 : index
    %c0_2 = arith.constant 0 : index
    %c0_3 = arith.constant 0 : index
    %2 = vector.load %arg1[%c1, %c0_2, %c0_3] : memref<4x8x128xf32, #tpu.memory_space<vmem>>, vector<1x8x128xf32>
    %3 = vector.shape_cast %2 : vector<1x8x128xf32> to vector<8x128xf32>
    %cst = arith.constant 0.000000e+00 : f32
    %4 = vector.broadcast %cst : f32 to vector<8x128xf32>
    %cst_4 = arith.constant 1.000000e+00 : f32
    %5 = vector.broadcast %cst_4 : f32 to vector<8x128xf32>
    %6 = arith.mulf %5, %1 : vector<8x128xf32>
    %7 = arith.addf %4, %6 : vector<8x128xf32>
    %cst_5 = arith.constant 0.000000e+00 : f32
    %cst_6 = arith.constant 5.000000e-01 : f32
    %8 = arith.subf %cst_5, %cst_6 : f32
    %9 = vector.broadcast %8 : f32 to vector<8x128xf32>
    %10 = arith.maximumf %7, %9 : vector<8x128xf32>
    %cst_7 = arith.constant 5.000000e-01 : f32
    %11 = vector.broadcast %cst_7 : f32 to vector<8x128xf32>
    %12 = arith.addf %10, %11 : vector<8x128xf32>
    %cst_8 = arith.constant 0.000000e+00 : f32
    %13 = vector.broadcast %cst_8 : f32 to vector<8x128xf32>
    %cst_9 = arith.constant -1.000000e+00 : f32
    %14 = vector.broadcast %cst_9 : f32 to vector<8x128xf32>
    %15 = arith.mulf %14, %3 : vector<8x128xf32>
    %16 = arith.addf %13, %15 : vector<8x128xf32>
    %cst_10 = arith.constant 0.000000e+00 : f32
    %17 = vector.broadcast %cst_10 : f32 to vector<8x128xf32>
    %18 = arith.subf %17, %16 : vector<8x128xf32>
    %cst_11 = arith.constant 1.000000e+03 : f32
    %19 = vector.broadcast %cst_11 : f32 to vector<8x128xf32>
    %20 = arith.mulf %18, %19 : vector<8x128xf32>
    %21 = arith.negf %20 : vector<8x128xf32>
    %22 = math.exp %21 : vector<8x128xf32>
    %cst_12 = arith.constant 1.000000e+00 : f32
    %23 = vector.broadcast %cst_12 : f32 to vector<8x128xf32>
    %24 = arith.addf %23, %22 : vector<8x128xf32>
    %25 = arith.divf %23, %24 : vector<8x128xf32>
    %26 = arith.mulf %12, %25 : vector<8x128xf32>
    %cst_13 = arith.constant 5.000000e-01 : f32
    %27 = vector.broadcast %cst_13 : f32 to vector<8x128xf32>
    %28 = arith.subf %26, %27 : vector<8x128xf32>
    %c0_14 = arith.constant 0 : index
    %c0_15 = arith.constant 0 : index
    %29 = vector.load %arg2[%c0_14, %c0_15] : memref<8x128xf32, #tpu.memory_space<vmem>>, vector<8x128xf32>
    tpu.vector_store %arg2[%c0_14, %c0_15], %28 {strides = array<i32>} : memref<8x128xf32, #tpu.memory_space<vmem>>, vector<8x128xf32>,
    return
  }
  func.func @transform_0(%arg0: i32) -> (i32, i32, i32) {
    %c0_i32 = arith.constant 0 : i32
    %c0_i32_0 = arith.constant 0 : i32
    %c0_i32_1 = arith.constant 0 : i32
    return %c0_i32, %arg0, %c0_i32_0 : i32, i32, i32
  }
  func.func @transform_1(%arg0: i32) -> (i32, i32) {
    %c0_i32 = arith.constant 0 : i32
    %c0_i32_0 = arith.constant 0 : i32
    return %arg0, %c0_i32 : i32, i32
  }
}

</mosaic_0001>

<bundles_post_ra>
// kernel: tpu_custom_call.1
= control target key start
LH: loop header
LB: loop body
LE: loop exit
PB: predicated region body
PF: predicated region fallthrough
CT: control target
= control target key end

     0   :  { %6 = vsyncpa [#allocation3], 0  ;;  %s153_s0 = inlined_call_operand.hbm [shape: f32[4,8,128], index: 0, kind: input, shape index: {}]   ;;  %s154_s1 = inlined_call_operand.hbm [shape: f32[8,128], index: 1, kind: output, shape index: {}]  }
   0x1   :  { %7 = vsyncpa [#allocation4], 0  ;;  %s115_s6 = smov [#allocation2]   ;;  %s67_s10 = scalar_lea.hbm %s153_s0, 512 }
   0x2   :  { %s13_s7 = sshll.u32 %s115_s6, 4  ;;  %p68_p0 = scmp.ne.s32.totalorder %s153_s0, %s67_s10  ;;  %s14_s7 = int_to_ptr.vmem [resolvable:$true] %s13_s7 }
   0x3   :  { %p71_p1 = scmp.lt.u32.totalorder %s67_s10, %s153_s0 }
   0x5   :  { %p73_p2 = pnand %p71_p1, %p68_p0 }
   0x7   :  { %76 = shalt.err (!%p73_p2)
}
   0x8   :  { %s77_s15 = scalar_lea.vmem %s14_s7, 512  ;;  %p82_p4 = scmp.lt.s32.totalorder %s14_s7, %s14_s7 }
   0x9   :  { %p78_p3 = scmp.ne.s32.totalorder %s14_s7, %s77_s15  ;;  %p83_p5 = scmp.lt.s32.totalorder %s77_s15, %s77_s15 }
   0xb   :  { %p84_p6 = por %p83_p5, %p82_p4 }
   0xd   :  { %p85_p7 = pnand %p84_p6, %p78_p3 }
   0xf   :  { %88 = shalt.err (!%p85_p7)
}
  0x10   :  { %s116_s16 = smov 128   ;;  %s117_s17 = smov 8  }
  0x11   :  { %19 = dma.hbm_to_vmem [thread:$0]  %s153_s0, 512, %s14_s7, [#allocation3], %s116_s16, %s116_s16, %s117_s17  }
  0x12   :  { %111 = dma.done.wait [#allocation3], 512  }
  0x13   :  { %112 = vsyncadd [#allocation3], 4294966784  ;;  %v25_v0 = vld [vmem:[#allocation2 + $0x8] sm:$0xff]  ;;  %v23_v7 = vld [vmem:[#allocation2] sm:$0xff]  ;;  %s118_s20 = smov [#allocation5]  }
  0x14   :  { %v29_v1 = vmul.f32 -1.0, %v25_v0  ;;  %v27_v8 = vmax.f32 %v23_v7, -0.5  ;;  %s48_s21 = sshll.u32 %s118_s20, 4  ;;  %s49_s21 = int_to_ptr.vmem [resolvable:$true] %s48_s21 }
  0x15   :  { %s89_s0 = scalar_lea.vmem %s49_s21, 128  ;;  %p94_p9 = scmp.lt.s32.totalorder %s49_s21, %s49_s21 }
  0x16   :  { %v31_v2 = vsub.f32 0.0, %v29_v1  ;;  %v28_v9 = vadd.f32 0.5, %v27_v8  ;;  %p90_p8 = scmp.ne.s32.totalorder %s49_s21, %s89_s0  ;;  %p95_p10 = scmp.lt.s32.totalorder %s89_s0, %s89_s0 }
  0x18   :  { %v57_v3 = vmul.f32 -1000.0, %v31_v2  ;;  %p96_p11 = por %p95_p10, %p94_p9 }
  0x1a   :  { %v34_v4 = vmul.f32 1.442695, %v57_v3  ;;  %p97_p12 = pnand %p96_p11, %p90_p8 }
  0x1c   :  { %63 = vpow2.f32 %v34_v4 }
  0x26   :  { %v64_v5 = vpop.eup %63 }
  0x27   :  { %v36_v6 = vadd.f32 1.0, %v64_v5 }
  0x29   :  { %65 = vrcp.f32 %v36_v6 }
  0x33   :  { %v66_v10 = vpop.eup %65 }
  0x34   :  { %v39_v11 = vmul.f32 %v66_v10, %v28_v9 }
  0x36   :  { %v58_v12 = vadd.f32 -0.5, %v39_v11 }
  0x38   :  { %41 = vst [vmem:[#allocation5] sm:$0xff] %v58_v12 }
  0x39   :  { %100 = shalt.err (!%p97_p12)
}
  0x3a   :  { %s101_s24 = scalar_lea.hbm %s154_s1, 128 }
  0x3b   :  { %p102_p13 = scmp.ne.s32.totalorder %s154_s1, %s101_s24  ;;  %p105_p0 = scmp.lt.u32.totalorder %s101_s24, %s154_s1 }
  0x3d   :  { %p107_p1 = pnand %p105_p0, %p102_p13 }
  0x3f   :  { %110 = shalt.err (!%p107_p1)
}
  0x40   :  { %51 = dma.vmem_to_hbm [thread:$0]  %s49_s21, 128, %s154_s1, [#allocation4]  }
  0x41   :  { %113 = dma.done.wait [#allocation4], 128  }
  0x42   :  { %114 = vsyncadd [#allocation4], 4294967168 }
  0x43   :  { %55 = vsyncpa [#allocation3], 1 }
  0x44   :  { %56 = vsyncpa [#allocation4], 1 }

</bundles_post_ra>
